<compile_context>
chip_gen: v7x
topology: tpu7x:2x2x1
jax: 0.10.0
libtpu: 0.0.40
codegen_flags: <defaults>
</compile_context>

<pallas_src>
import functools

import jax
import jax.numpy as jnp
from jax import lax
from jax.experimental import pallas as pl
from jax.experimental.pallas import tpu as pltpu

_LANES = 128


def _flow_to_depth_kernel(params_ref, tbase_ref, flow_ref, out_ref, *,
                          width, height, normalized_flow, inverse_depth):
    """Per-pixel ray-constrained triangulation hot path.

    Grid axis 0 = batch element, axis 1 = row tile of the lane-dense packed
    (rows, 128) pixel layout.  Pure VPU/EUP kernel (no MXU).
    """
    b = pl.program_id(0)
    t = pl.program_id(1)

    th = flow_ref.shape[2]      # tile rows
    lanes = flow_ref.shape[3]   # 128

    # ---- scalar params (1-D SMEM): M = P2[:, :3] @ K1^{-1} (row-major 3x3)
    # followed by b = P2[:, 3] ----------------------------------------------
    base = b * 12
    m00 = params_ref[base + 0]
    m01 = params_ref[base + 1]
    m02 = params_ref[base + 2]
    m10 = params_ref[base + 3]
    m11 = params_ref[base + 4]
    m12 = params_ref[base + 5]
    m20 = params_ref[base + 6]
    m21 = params_ref[base + 7]
    m22 = params_ref[base + 8]
    b0 = params_ref[base + 9]
    b1 = params_ref[base + 10]
    b2 = params_ref[base + 11]

    # ---- integer pixel coords (u1, v1) from per-tile bases -----------------
    # tbase holds (v_base, u_base) per tile so all per-pixel index math stays
    # below 2^22 -> the float floor-div trick below is exact for any image.
    vbase = tbase_ref[2 * t]
    ubase = tbase_ref[2 * t + 1]
    row_i = lax.broadcasted_iota(jnp.int32, (th, lanes), 0)
    lane_i = lax.broadcasted_iota(jnp.int32, (th, lanes), 1)
    off_f = (row_i * lanes + lane_i).astype(jnp.float32) + ubase
    inv_w = jnp.float32(1.0 / width)
    dv = jnp.floor((off_f + jnp.float32(0.5)) * inv_w)
    u1 = off_f - dv * jnp.float32(width)
    v1 = dv + vbase

    fx = flow_ref[0, 0, :, :]
    fy = flow_ref[0, 1, :, :]
    if normalized_flow:
        fx = fx * jnp.float32(width)
        fy = fy * jnp.float32(height)
    u2 = u1 + fx
    v2 = v1 + fy

    # ---- ray-constrained solve ---------------------------------------------
    # X = Z * K1^{-1} [u1, v1, 1]; projected into view 2:
    #   x2_h = Z * (M @ [u1, v1, 1]) + b,  M = P2[:, :3] K1^{-1},  b = P2[:, 3]
    # The two reprojection constraints c_i * Z = d_i are solved in least
    # squares:  Z = (c.d) / (c.c).
    a0 = m00 * u1 + m01 * v1 + m02
    a1 = m10 * u1 + m11 * v1 + m12
    a2 = m20 * u1 + m21 * v1 + m22

    c0 = a0 - u2 * a2
    c1 = a1 - v2 * a2
    d0 = u2 * b2 - b0
    d1 = v2 * b2 - b1

    num_cd = c0 * d0 + c1 * d1          # Z numerator   (any sign)
    den_cc = c0 * c0 + c1 * c1          # Z denominator (>= 0)

    eps = jnp.float32(1e-20)
    if inverse_depth:
        numer = den_cc
        # sign-preserving guard against zero-parallax pixels (3 ops).
        denom = num_cd + jnp.where(num_cd < jnp.float32(0.0), -eps, eps)
    else:
        numer = num_cd
        denom = jnp.maximum(den_cc, eps)

    # EUP approximate reciprocal + one Newton-Raphson step (~f32 accuracy).
    r = pl.reciprocal(denom, approx=True)
    r = r * (jnp.float32(2.0) - denom * r)
    out_ref[0, 0, :, :] = (numer * r).astype(out_ref.dtype)


def _axis_angle_to_rotation_matrix(r):
    """Rodrigues formula, 3-vector axis-angle -> 3x3 rotation (plain JAX glue)."""
    theta = jnp.sqrt(jnp.sum(r * r))
    safe = jnp.where(theta < 1e-8, 1.0, theta)
    k = r / safe
    kx, ky, kz = k[0], k[1], k[2]
    zero = jnp.zeros((), r.dtype)
    Km = jnp.stack([jnp.stack([zero, -kz, ky]),
                    jnp.stack([kz, zero, -kx]),
                    jnp.stack([-ky, kx, zero])])
    R = (jnp.eye(3, dtype=r.dtype) + jnp.sin(theta) * Km
         + (1.0 - jnp.cos(theta)) * (Km @ Km))
    return jnp.where(theta < 1e-8, jnp.eye(3, dtype=r.dtype), R)


def flow_to_depth_layer(K1, K2, flow, rot, trans, *, shared_K=True,
                        normalized_K=False, normalized_flow=True,
                        inverse_depth=True, tile_rows=2048):
    """JAX/Pallas equivalent of FlowToDepthLayer.forward."""
    flow = flow.astype(jnp.float32)
    n, _, h, w = flow.shape

    if shared_K:
        K1b = jnp.broadcast_to(K1.astype(jnp.float32), (n, 3, 3))
        K2b = jnp.broadcast_to(K2.astype(jnp.float32), (n, 3, 3))
    else:
        K1b = K1.astype(jnp.float32)
        K2b = K2.astype(jnp.float32)
    if normalized_K:
        tmp = jnp.array([[w, 0, 0], [0, h, 0], [0, 0, 1]], jnp.float32)
        K1b = jnp.einsum('ij,njk->nik', tmp, K1b)
        K2b = jnp.einsum('ij,njk->nik', tmp, K2b)

    # Tiny per-batch 3x3 / 3x4 products stay in plain JAX (glue, runs once).
    R = jax.vmap(_axis_angle_to_rotation_matrix)(rot.astype(jnp.float32))
    RT = jnp.concatenate([R, trans.astype(jnp.float32)[:, :, None]], axis=2)
    P2 = jnp.einsum('nij,njk->nik', K2b, RT)
    # Fold the first-view back-projection into the second-view projection:
    # M = P2[:, :3] @ K1^{-1},  b = P2[:, 3].  Flattened 1-D to keep SMEM tiny.
    K1inv = jnp.linalg.inv(K1b)
    M = jnp.einsum('nij,njk->nik', P2[:, :, :3], K1inv)
    params = jnp.concatenate([M.reshape(n, 9), P2[:, :, 3]], axis=1)  # (n, 12)
    params = params.reshape(-1)                                       # (n*12,)

    # ---- lane-dense spatial packing: (h, w) -> (rows, 128) -----------------
    hw = h * w
    rows = -(-hw // _LANES)

    # Tile-height selection.  Cap keeps double-buffered blocks well under the
    # v7x 32 MiB scoped-VMEM default and preserves exact float index math.
    tile_rows = min(tile_rows, 8192)
    th = min(tile_rows, rows)
    if th < rows:
        th = max(8, (th // 8) * 8)       # sublane-aligned when not full-extent
    n_tiles = -(-rows // th)
    if n * n_tiles < 2 and rows >= 16:
        # v7x megacore: guarantee >= 2 parallel grid programs.
        th = ((-(-rows // 2)) + 7) // 8 * 8
        n_tiles = -(-rows // th)

    flow_flat = flow.reshape(n, 2, hw)
    if hw % _LANES == 0:
        pad = 0
        flow_packed = flow_flat.reshape(n, 2, rows, _LANES)   # zero-copy view
    else:
        # Slow path: one pad copy to the next multiple of 128 only (not to a
        # tile multiple); ragged row tiles are masked by Pallas itself.
        pad = rows * _LANES - hw
        flow_packed = jnp.pad(flow_flat, ((0, 0), (0, 0), (0, pad)))
        flow_packed = flow_packed.reshape(n, 2, rows, _LANES)

    # Per-tile exact (v_base, u_base) pixel-coordinate bases (host-side ints).
    tb = []
    for t in range(n_tiles):
        start = t * th * _LANES
        tb.append(float(start // w))
        tb.append(float(start % w))
    tile_bases = jnp.asarray(tb, dtype=jnp.float32)            # (2*n_tiles,)

    kernel = functools.partial(_flow_to_depth_kernel,
                               width=w, height=h,
                               normalized_flow=normalized_flow,
                               inverse_depth=inverse_depth)
    out_packed = pl.pallas_call(
        kernel,
        out_shape=jax.ShapeDtypeStruct((n, 1, rows, _LANES), jnp.float32),
        grid=(n, n_tiles),
        in_specs=[
            # folded projection scalars: whole (n*12,) array in SMEM
            pl.BlockSpec(memory_space=pltpu.MemorySpace.SMEM),
            # per-tile coordinate bases: whole (2*n_tiles,) array in SMEM
            pl.BlockSpec(memory_space=pltpu.MemorySpace.SMEM),
            # flow: one lane-dense row tile per grid step in VMEM
            pl.BlockSpec((1, 2, th, _LANES), lambda b, t: (b, 0, t, 0)),
        ],
        out_specs=pl.BlockSpec((1, 1, th, _LANES), lambda b, t: (b, 0, t, 0)),
        compiler_params=pltpu.CompilerParams(
            dimension_semantics=("parallel", "parallel")),
    )(params, tile_bases, flow_packed)

    out_flat = out_packed.reshape(n, 1, rows * _LANES)
    if pad:
        out_flat = out_flat[:, :, :hw]
    return out_flat.reshape(n, 1, h, w)


if __name__ == "__main__":
    key = jax.random.PRNGKey(0)
    k1, k2 = jax.random.split(key, 2)
    n, h, w = 2, 16, 16

    # Deterministic intrinsics / motion / ground-truth depth.
    K = jnp.array([[20.0, 0.0, 8.0],
                   [0.0, 20.0, 8.0],
                   [0.0, 0.0, 1.0]], jnp.float32)
    rot = 0.05 * jax.random.normal(k1, (n, 3), jnp.float32)
    trans = jnp.array([[0.30, 0.05, 0.02],
                       [-0.25, 0.10, -0.03]], jnp.float32)
    depth_gt = 2.0 + jax.random.uniform(k2, (n, h, w), dtype=jnp.float32)

    # Build a geometrically consistent *normalized* flow from depth_gt (glue).
    uu, vv = jnp.meshgrid(jnp.arange(w, dtype=jnp.float32),
                          jnp.arange(h, dtype=jnp.float32))
    p1 = jnp.stack([uu, vv, jnp.ones_like(uu)], axis=0)            # (3, h, w)
    rays = jnp.einsum('ij,jhw->ihw', jnp.linalg.inv(K), p1)        # (3, h, w)
    X = depth_gt[:, None] * rays[None]                             # (n, 3, h, w)
    Rm = jax.vmap(_axis_angle_to_rotation_matrix)(rot)
    X2 = jnp.einsum('nij,njhw->nihw', Rm, X) + trans[:, :, None, None]
    x2 = jnp.einsum('ij,njhw->nihw', K, X2)
    u2 = x2[:, 0] / x2[:, 2]
    v2 = x2[:, 1] / x2[:, 2]
    flow = jnp.stack([(u2 - uu[None]) / w, (v2 - vv[None]) / h], axis=1)

    out = flow_to_depth_layer(K, K, flow, rot, trans, shared_K=True)
    out = jax.block_until_ready(out)

    assert out.shape == (n, 1, h, w) and out.dtype == jnp.float32
    # Kernel should recover the inverse depth that generated the flow.
    assert jnp.allclose(out[:, 0], 1.0 / depth_gt, rtol=2e-2, atol=2e-3), (
        float(jnp.max(jnp.abs(out[:, 0] - 1.0 / depth_gt))))
    print("KERNEL_OK")
</pallas_src>

<mosaic_0001>
module attributes {stable_mosaic.version = 11 : i64} {
  func.func @_flow_to_depth_kernel(%arg0: i32, %arg1: i32, %arg2: memref<24xf32, #tpu.memory_space<smem>>, %arg3: memref<2xf32, #tpu.memory_space<smem>>, %arg4: memref<1x2x2x128xf32, #tpu.memory_space<vmem>>, %arg5: memref<1x1x2x128xf32, #tpu.memory_space<vmem>>) attributes {dimension_semantics = [#tpu.dimension_semantics<parallel>, #tpu.dimension_semantics<parallel>], iteration_bounds = array<i64: 2, 1>, scalar_prefetch = 0 : i64, scratch_operands = 0 : i64, tpu.core_type = #tpu.core_type<tc>, window_params = [{transform_indices = @transform_0, window_bounds = array<i64: 24>}, {transform_indices = @transform_1, window_bounds = array<i64: 2>}, {transform_indices = @transform_2, window_bounds = array<i64: 1, 2, 2, 128>}, {transform_indices = @transform_3, window_bounds = array<i64: 1, 1, 2, 128>}]} {
    %c12_i32 = arith.constant 12 : i32
    %0 = arith.muli %arg0, %c12_i32 : i32
    %c0_i32 = arith.constant 0 : i32
    %1 = arith.addi %0, %c0_i32 : i32
    %2 = arith.index_cast %1 : i32 to index
    %3 = memref.load %arg2[%2] : memref<24xf32, #tpu.memory_space<smem>>
    %c1_i32 = arith.constant 1 : i32
    %4 = arith.addi %0, %c1_i32 : i32
    %5 = arith.index_cast %4 : i32 to index
    %6 = memref.load %arg2[%5] : memref<24xf32, #tpu.memory_space<smem>>
    %c2_i32 = arith.constant 2 : i32
    %7 = arith.addi %0, %c2_i32 : i32
    %8 = arith.index_cast %7 : i32 to index
    %9 = memref.load %arg2[%8] : memref<24xf32, #tpu.memory_space<smem>>
    %c3_i32 = arith.constant 3 : i32
    %10 = arith.addi %0, %c3_i32 : i32
    %11 = arith.index_cast %10 : i32 to index
    %12 = memref.load %arg2[%11] : memref<24xf32, #tpu.memory_space<smem>>
    %c4_i32 = arith.constant 4 : i32
    %13 = arith.addi %0, %c4_i32 : i32
    %14 = arith.index_cast %13 : i32 to index
    %15 = memref.load %arg2[%14] : memref<24xf32, #tpu.memory_space<smem>>
    %c5_i32 = arith.constant 5 : i32
    %16 = arith.addi %0, %c5_i32 : i32
    %17 = arith.index_cast %16 : i32 to index
    %18 = memref.load %arg2[%17] : memref<24xf32, #tpu.memory_space<smem>>
    %c6_i32 = arith.constant 6 : i32
    %19 = arith.addi %0, %c6_i32 : i32
    %20 = arith.index_cast %19 : i32 to index
    %21 = memref.load %arg2[%20] : memref<24xf32, #tpu.memory_space<smem>>
    %c7_i32 = arith.constant 7 : i32
    %22 = arith.addi %0, %c7_i32 : i32
    %23 = arith.index_cast %22 : i32 to index
    %24 = memref.load %arg2[%23] : memref<24xf32, #tpu.memory_space<smem>>
    %c8_i32 = arith.constant 8 : i32
    %25 = arith.addi %0, %c8_i32 : i32
    %26 = arith.index_cast %25 : i32 to index
    %27 = memref.load %arg2[%26] : memref<24xf32, #tpu.memory_space<smem>>
    %c9_i32 = arith.constant 9 : i32
    %28 = arith.addi %0, %c9_i32 : i32
    %29 = arith.index_cast %28 : i32 to index
    %30 = memref.load %arg2[%29] : memref<24xf32, #tpu.memory_space<smem>>
    %c10_i32 = arith.constant 10 : i32
    %31 = arith.addi %0, %c10_i32 : i32
    %32 = arith.index_cast %31 : i32 to index
    %33 = memref.load %arg2[%32] : memref<24xf32, #tpu.memory_space<smem>>
    %c11_i32 = arith.constant 11 : i32
    %34 = arith.addi %0, %c11_i32 : i32
    %35 = arith.index_cast %34 : i32 to index
    %36 = memref.load %arg2[%35] : memref<24xf32, #tpu.memory_space<smem>>
    %c2_i32_0 = arith.constant 2 : i32
    %37 = arith.muli %c2_i32_0, %arg1 : i32
    %38 = arith.index_cast %37 : i32 to index
    %39 = memref.load %arg3[%38] : memref<2xf32, #tpu.memory_space<smem>>
    %c2_i32_1 = arith.constant 2 : i32
    %40 = arith.muli %c2_i32_1, %arg1 : i32
    %c1_i32_2 = arith.constant 1 : i32
    %41 = arith.addi %40, %c1_i32_2 : i32
    %42 = arith.index_cast %41 : i32 to index
    %43 = memref.load %arg3[%42] : memref<2xf32, #tpu.memory_space<smem>>
    %44 = tpu.iota {dimensions = array<i32: 0>} : vector<2x128xi32>
    %45 = tpu.iota {dimensions = array<i32: 1>} : vector<2x128xi32>
    %c128_i32 = arith.constant 128 : i32
    %46 = vector.broadcast %c128_i32 : i32 to vector<2x128xi32>
    %47 = arith.muli %44, %46 : vector<2x128xi32>
    %48 = arith.addi %47, %45 : vector<2x128xi32>
    %49 = arith.sitofp %48 : vector<2x128xi32> to vector<2x128xf32>
    %50 = vector.broadcast %43 : f32 to vector<2x128xf32>
    %51 = arith.addf %49, %50 : vector<2x128xf32>
    %cst = arith.constant 5.000000e-01 : f32
    %52 = vector.broadcast %cst : f32 to vector<2x128xf32>
    %53 = arith.addf %51, %52 : vector<2x128xf32>
    %cst_3 = arith.constant 6.250000e-02 : f32
    %54 = vector.broadcast %cst_3 : f32 to vector<2x128xf32>
    %55 = arith.mulf %53, %54 : vector<2x128xf32>
    %56 = math.floor %55 : vector<2x128xf32>
    %cst_4 = arith.constant 1.600000e+01 : f32
    %57 = vector.broadcast %cst_4 : f32 to vector<2x128xf32>
    %58 = arith.mulf %56, %57 : vector<2x128xf32>
    %59 = arith.subf %51, %58 : vector<2x128xf32>
    %60 = vector.broadcast %39 : f32 to vector<2x128xf32>
    %61 = arith.addf %56, %60 : vector<2x128xf32>
    %c0 = arith.constant 0 : index
    %c0_5 = arith.constant 0 : index
    %c0_6 = arith.constant 0 : index
    %c0_7 = arith.constant 0 : index
    %62 = vector.load %arg4[%c0, %c0_5, %c0_6, %c0_7] : memref<1x2x2x128xf32, #tpu.memory_space<vmem>>, vector<1x1x2x128xf32>
    %63 = vector.shape_cast %62 : vector<1x1x2x128xf32> to vector<2x128xf32>
    %c0_8 = arith.constant 0 : index
    %c1 = arith.constant 1 : index
    %c0_9 = arith.constant 0 : index
    %c0_10 = arith.constant 0 : index
    %64 = vector.load %arg4[%c0_8, %c1, %c0_9, %c0_10] : memref<1x2x2x128xf32, #tpu.memory_space<vmem>>, vector<1x1x2x128xf32>
    %65 = vector.shape_cast %64 : vector<1x1x2x128xf32> to vector<2x128xf32>
    %cst_11 = arith.constant 1.600000e+01 : f32
    %66 = vector.broadcast %cst_11 : f32 to vector<2x128xf32>
    %67 = arith.mulf %63, %66 : vector<2x128xf32>
    %cst_12 = arith.constant 1.600000e+01 : f32
    %68 = vector.broadcast %cst_12 : f32 to vector<2x128xf32>
    %69 = arith.mulf %65, %68 : vector<2x128xf32>
    %70 = arith.addf %59, %67 : vector<2x128xf32>
    %71 = arith.addf %61, %69 : vector<2x128xf32>
    %72 = vector.broadcast %3 : f32 to vector<2x128xf32>
    %73 = arith.mulf %72, %59 : vector<2x128xf32>
    %74 = vector.broadcast %6 : f32 to vector<2x128xf32>
    %75 = arith.mulf %74, %61 : vector<2x128xf32>
    %76 = arith.addf %73, %75 : vector<2x128xf32>
    %77 = vector.broadcast %9 : f32 to vector<2x128xf32>
    %78 = arith.addf %76, %77 : vector<2x128xf32>
    %79 = vector.broadcast %12 : f32 to vector<2x128xf32>
    %80 = arith.mulf %79, %59 : vector<2x128xf32>
    %81 = vector.broadcast %15 : f32 to vector<2x128xf32>
    %82 = arith.mulf %81, %61 : vector<2x128xf32>
    %83 = arith.addf %80, %82 : vector<2x128xf32>
    %84 = vector.broadcast %18 : f32 to vector<2x128xf32>
    %85 = arith.addf %83, %84 : vector<2x128xf32>
    %86 = vector.broadcast %21 : f32 to vector<2x128xf32>
    %87 = arith.mulf %86, %59 : vector<2x128xf32>
    %88 = vector.broadcast %24 : f32 to vector<2x128xf32>
    %89 = arith.mulf %88, %61 : vector<2x128xf32>
    %90 = arith.addf %87, %89 : vector<2x128xf32>
    %91 = vector.broadcast %27 : f32 to vector<2x128xf32>
    %92 = arith.addf %90, %91 : vector<2x128xf32>
    %93 = arith.mulf %70, %92 : vector<2x128xf32>
    %94 = arith.subf %78, %93 : vector<2x128xf32>
    %95 = arith.mulf %71, %92 : vector<2x128xf32>
    %96 = arith.subf %85, %95 : vector<2x128xf32>
    %97 = vector.broadcast %36 : f32 to vector<2x128xf32>
    %98 = arith.mulf %70, %97 : vector<2x128xf32>
    %99 = vector.broadcast %30 : f32 to vector<2x128xf32>
    %100 = arith.subf %98, %99 : vector<2x128xf32>
    %101 = vector.broadcast %36 : f32 to vector<2x128xf32>
    %102 = arith.mulf %71, %101 : vector<2x128xf32>
    %103 = vector.broadcast %33 : f32 to vector<2x128xf32>
    %104 = arith.subf %102, %103 : vector<2x128xf32>
    %105 = arith.mulf %94, %100 : vector<2x128xf32>
    %106 = arith.mulf %96, %104 : vector<2x128xf32>
    %107 = arith.addf %105, %106 : vector<2x128xf32>
    %108 = arith.mulf %94, %94 : vector<2x128xf32>
    %109 = arith.mulf %96, %96 : vector<2x128xf32>
    %110 = arith.addf %108, %109 : vector<2x128xf32>
    %cst_13 = arith.constant 0.000000e+00 : f32
    %111 = vector.broadcast %cst_13 : f32 to vector<2x128xf32>
    %112 = arith.cmpf olt, %107, %111 : vector<2x128xf32>
    %cst_14 = arith.constant 0.000000e+00 : f32
    %cst_15 = arith.constant 9.99999968E-21 : f32
    %113 = arith.subf %cst_14, %cst_15 : f32
    %cst_16 = arith.constant 9.99999968E-21 : f32
    %114 = vector.broadcast %113 : f32 to vector<2x128xf32>
    %115 = vector.broadcast %cst_16 : f32 to vector<2x128xf32>
    %116 = arith.select %112, %114, %115 : vector<2x128xi1>, vector<2x128xf32>
    %117 = arith.addf %107, %116 : vector<2x128xf32>
    %118 = tpu.reciprocal %117 {approx = true} : vector<2x128xf32> -> vector<2x128xf32>
    %119 = arith.mulf %117, %118 : vector<2x128xf32>
    %cst_17 = arith.constant 2.000000e+00 : f32
    %120 = vector.broadcast %cst_17 : f32 to vector<2x128xf32>
    %121 = arith.subf %120, %119 : vector<2x128xf32>
    %122 = arith.mulf %118, %121 : vector<2x128xf32>
    %123 = arith.mulf %110, %122 : vector<2x128xf32>
    %c0_18 = arith.constant 0 : index
    %c0_19 = arith.constant 0 : index
    %c0_20 = arith.constant 0 : index
    %c0_21 = arith.constant 0 : index
    %124 = vector.load %arg5[%c0_18, %c0_19, %c0_20, %c0_21] : memref<1x1x2x128xf32, #tpu.memory_space<vmem>>, vector<1x1x2x128xf32>
    %125 = vector.shape_cast %124 : vector<1x1x2x128xf32> to vector<2x128xf32>
    %126 = vector.shape_cast %123 : vector<2x128xf32> to vector<1x1x2x128xf32>
    tpu.vector_store %arg5[%c0_18, %c0_19, %c0_20, %c0_21], %126 {strides = array<i32>} : memref<1x1x2x128xf32, #tpu.memory_space<vmem>>, vector<1x1x2x128xf32>,
    return
  }
  func.func @transform_0(%arg0: i32, %arg1: i32) -> i32 {
    %c0_i32 = arith.constant 0 : i32
    %c0_i32_0 = arith.constant 0 : i32
    return %c0_i32 : i32
  }
  func.func @transform_1(%arg0: i32, %arg1: i32) -> i32 {
    %c0_i32 = arith.constant 0 : i32
    %c0_i32_0 = arith.constant 0 : i32
    return %c0_i32 : i32
  }
  func.func @transform_2(%arg0: i32, %arg1: i32) -> (i32, i32, i32, i32) {
    %c0_i32 = arith.constant 0 : i32
    %c0_i32_0 = arith.constant 0 : i32
    %c0_i32_1 = arith.constant 0 : i32
    return %arg0, %c0_i32, %arg1, %c0_i32_0 : i32, i32, i32, i32
  }
  func.func @transform_3(%arg0: i32, %arg1: i32) -> (i32, i32, i32, i32) {
    %c0_i32 = arith.constant 0 : i32
    %c0_i32_0 = arith.constant 0 : i32
    %c0_i32_1 = arith.constant 0 : i32
    return %arg0, %c0_i32, %arg1, %c0_i32_0 : i32, i32, i32, i32
  }
}

</mosaic_0001>

<bundles_post_ra>
// kernel: tpu_custom_call.1
= control target key start
LH: loop header
LB: loop body
LE: loop exit
PB: predicated region body
PF: predicated region fallthrough
CT: control target
= control target key end

     0   :  { %s1014_s0 = inlined_call_operand.hbm [shape: f32[24], index: 0, kind: input, shape index: {}]   ;;  %s1015_s1 = inlined_call_operand.vmem [shape: f32[2], index: 1, kind: input, shape index: {}]   ;;  %s1016_s2 = inlined_call_operand.hbm [shape: f32[2,2,2,128], index: 2, kind: input, shape index: {}]   ;;  %s1017_s3 = inlined_call_operand.hbm [shape: f32[2,1,2,128], index: 3, kind: output, shape index: {}]  }
   0x1   :  { %1023 = sst [smem:[#allocation15_spill]] %s1014_s0 }
   0x2   :  { %1024 = sst [smem:[#allocation16_spill]] %s1015_s1 }
   0x3   :  { %1025 = sst [smem:[#allocation17_spill]] %s1016_s2 }
   0x4   :  { %8 = vsyncpa [#allocation5], 0 }
   0x5   :  { %9 = vsyncpa [#allocation6], 0 }
   0x6   :  { %10 = vsyncpa [#allocation3], 0 }
   0x7   :  { %12 = vsyncpa [#allocation3 + $0x1], 0 }
   0x8   :  { %13 = vsyncpa [#allocation4], 0 }
   0x9   :  { %15 = vsyncpa [#allocation4 + $0x1], 0  ;;  %s735_s12 = smov 0   ;;  %s737_s13 = smov 0  }
   0xa   :  { %s739_s14 = smov 0   ;;  %s741_s15 = smov 0  }
   0xb   :  { %s743_s16 = smov 0   ;;  %s745_s17 = smov 0  }
   0xc LB: > { %s449_s18 = sadd.s32 4294967295, %s706_s17   ;;  %s450_s19 = sadd.s32 4294967294, %s706_s17   ;;  %s706_s17 = sphi %s745_s17, %s21_s17   ;;  %s702_s16 = sphi %s743_s16, %s1047_s16   ;;  %s698_s15 = sphi %s741_s15, %s1046_s15   ;;  %s694_s14 = sphi %s739_s14, %s1045_s14   ;;  %s690_s13 = sphi %s737_s13, %s1044_s13   ;;  %s686_s12 = sphi %s735_s12, %s1043_s12  }
   0xd   : > { %s84_s20 = sadd.s32 1, %s694_s14  ;;  %p91_p0 = scmp.ne.s32.totalorder %s694_s14, %s690_s13 }
   0xe   : > { %p92_p1 = scmp.eq.s32.totalorder %s706_s17, 0  ;;  %p97_p2 = scmp.ne.s32.totalorder %s690_s13, %s686_s12 }
   0xf   : > { %p773_p3 = scmp.eq.s32.totalorder %s449_s18, 0  ;;  %p123_p4 = scmp.eq.s32.totalorder %s449_s18, 1 }
  0x10   : > { %p93_p5 = por %p92_p1, %p91_p0  ;;  %p129_p6 = scmp.eq.s32.totalorder %s450_s19, 1 }
  0x11   : > { %s1026_s21 = scalar_select %p773_p3, 1, 0 }
  0x12   : > { %p779_p7 = por %p773_p3, %p97_p2  ;;  %p783_p8 = por %p123_p4, %p91_p0 }
  0x13   : > { %p787_p9 = por %p129_p6, %p97_p2  ;;  %p451_p10 = scmp.ge.s32.totalorder %s706_s17, 1 }
  0x14   : > { %s1027_s22 = scalar_select %p779_p7, 1, 0 }
  0x15   : > { %s1028_s23 = scalar_select %p783_p8, 1, 0 }
  0x16   : > { %s1029_s24 = scalar_select %p787_p9, 1, 0 }
  0x17   : > { %p136_p11 = scmp.lt.s32.totalorder %s706_s17, 3  ;;  %p499_p1 = scmp.lt.s32.totalorder %s706_s17, 2 }
  0x18   : > { %s1031_s1 = sld [smem:[#allocation16_spill]]  ;;  %s169_s4 = sand.u32 1, %s694_s14  }
  0x19   : > { %p794_p13 = pnand %p451_p10, %p136_p11  ;;  %p804_p4 = pnand %p499_p1, %p93_p5 }
  0x1a   : > { %s33_s5 = sadd.s32 1, %s702_s16  ;;  %s1034_s0 = sld [smem:[#allocation15_spill]] }
  0x1b   : > { %p482_p0 = pneg %p794_p13 }
  0x1d   : > { %p810_p2 = pnand %p482_p0, %p773_p3 }
  0x1e   : > { %s158_s28 = sshll.u32 %s1031_s1, 4  ;;  %s159_s28 = int_to_ptr.vmem [resolvable:$true] %s158_s28 }
  0x1f   : > { %p560_p6 = pneg %p810_p2 }
  0x20   : > { %s558_s8 = scalar_lea.hbm %s1034_s0, 16 }
  0x21   : > { %p559_p5 = scmp.ne.s32.totalorder %s1034_s0, %s558_s8  ;;  %p565_p1 = scmp.lt.u32.totalorder %s558_s8, %s1034_s0 }
  0x23   : > { %p561_p10 = pnand %p560_p6, %p559_p5 }
  0x25   : > { %p562_p11 = pneg %p561_p10 }
  0x27   : > { %p567_p0 = pnand %p565_p1, %p562_p11 }
  0x29   : > { %570 = shalt.err (!%p567_p0)
}
  0x2a   : > { %s708_s19 = smov [#allocation2]   ;;  %s571_s6 = scalar_lea.vmem %s159_s28, 16 }
  0x2b   : > { %485 = dma.hbm_to_smem (!%p810_p2), %s1034_s0, 16, %s708_s19, [#allocation5]  }
  0x2c   : > { %p572_p12 = scmp.ne.s32.totalorder %s159_s28, %s571_s6  ;;  %p579_p7 = scmp.lt.s32.totalorder %s159_s28, %s159_s28 }
  0x2d   : > { %p580_p5 = scmp.lt.s32.totalorder %s571_s6, %s571_s6 }
  0x2e   : > { %p574_p9 = pnand %p572_p12, %p560_p6 }
  0x2f   : > { %p581_p10 = por %p580_p5, %p579_p7 }
  0x30   : > { %p575_p8 = pneg %p574_p9 }
  0x32   : > { %p582_p3 = pnand %p581_p10, %p575_p8 }
  0x34   : > { %585 = shalt.err (!%p582_p3)
}
  0x35   : > { %s709_s7 = smov [#allocation7]   ;;  %p35_p11 = scmp.ge.s32.totalorder %s33_s5, 2 }
  0x36   : > { %488 = dma.vmem_to_smem (!%p810_p2), %s159_s28, 16, %s709_s7, [#allocation6]  }
  0x37   : > { %s455_s8 = sshll.u32 %s169_s4, 2  ;;  %s469_s9 = sshll.u32 %s702_s16, 6 }
  0x38   : > { %s1049_s5 = smov (%p35_p11, %s33_s5), 0  ;;  %s1036_s2 = sld [smem:[#allocation17_spill]] }
  0x39   : > { %1035 = sst [smem:[#allocation14_spill]] %s1049_s5  ;;  %s79_s18 = ssub.s32 %s702_s16, %s1049_s5 }
  0x3a   : > { %s173_s19 = scalar_lea.vmem [#allocation8], %s455_s8  ;;  %p82_p3 = scmp.eq.s32.totalorder %s79_s18, 0 }
  0x3b   : > { %s181_s28 = sshll.u32 %s173_s19, 4  ;;  %s855_s27 = scalar_lea.sflag [#allocation3], %s169_s4  ;;  %s846_s28 = int_to_ptr.vmem [resolvable:$true] %s181_s28 }
  0x3c   : > { %s851_s26 = scalar_select %p82_p3, %s694_s14, %s84_s20  }
  0x3d   : > { %p588_p8 = pneg %p804_p4 }
  0x3e   : > { %s842_s30 = scalar_lea.hbm %s1036_s2, %s469_s9  ;;  %s591_s9 = scalar_lea.hbm %s1036_s2, 128 }
  0x3f   : > { %s586_s6 = scalar_lea.hbm %s842_s30, 64  ;;  %p592_p2 = scmp.lt.u32.totalorder %s842_s30, %s1036_s2 }
  0x40   : > { %p587_p7 = scmp.ne.s32.totalorder %s842_s30, %s586_s6  ;;  %p593_p6 = scmp.lt.u32.totalorder %s591_s9, %s586_s6 }
  0x41   : > { %p595_p0 = scmp.lt.u32.totalorder %s586_s6, %s842_s30 }
  0x42   : > { %p589_p9 = pnand %p588_p8, %p587_p7  ;;  %p594_p1 = por %p593_p6, %p592_p2 }
  0x44   : > { %p590_p12 = pneg %p589_p9  ;;  %p596_p5 = por %p595_p0, %p594_p1 }
  0x46   : > { %p597_p10 = pnand %p596_p5, %p590_p12 }
  0x48   : > { %600 = shalt.err (!%p597_p10)
}
  0x49   : > { %s601_s20 = scalar_lea.vmem %s846_s28, 64  ;;  %s710_s4 = smov [#allocation8]  }
  0x4a   : > { %p602_p11 = scmp.ne.s32.totalorder %s846_s28, %s601_s20  ;;  %s606_s18 = sshll.u32 %s710_s4, 4  ;;  %s607_s18 = int_to_ptr.vmem [resolvable:$false] %s606_s18 }
  0x4b   : > { %s608_s19 = scalar_lea.vmem %s607_s18, 128  ;;  %p609_p9 = scmp.lt.s32.totalorder %s846_s28, %s607_s18 }
  0x4c   : > { %p604_p3 = pnand %p602_p11, %p588_p8  ;;  %p610_p2 = scmp.lt.s32.totalorder %s608_s19, %s601_s20 }
  0x4e   : > { %p605_p7 = pneg %p604_p3  ;;  %p611_p6 = por %p610_p2, %p609_p9 }
  0x50   : > { %p612_p1 = pnand %p611_p6, %p605_p7 }
  0x52   : > { %615 = shalt.err (!%p612_p1)
}
  0x53   : > { %s711_s6 = smov 32   ;;  %s712_s7 = smov 2  }
  0x54   : > { %492 = dma.hbm_to_vmem [thread:$0]  (!%p804_p4), %s842_s30, 64, %s846_s28, %s855_s27, %s711_s6, %s711_s6, %s712_s7  }
  0x55   : > { %193 = sbr.rel (%p794_p13) target bundleno = 174 (0xae), region = 32  ;;  %p1037_p8 = scmp.ne.s32.totalorder (!%p794_p13), %s1026_s21, 0 }
  0x5c   : > { %669 = dma.done.wait (%p1037_p8), [#allocation5], 16  }
  0x5d   : > { %671 = vsyncadd (%p1037_p8), [#allocation5], 4294967280 }
  0x5e   : > { %673 = dma.done.wait (%p1037_p8), [#allocation6], 16  }
  0x5f   : > { %675 = vsyncadd (%p1037_p8), [#allocation6], 4294967280  ;;  %s894_s8 = sand.u32 1, %s690_s13   ;;  %p1038_p13 = scmp.ne.s32.totalorder %s1027_s22, 0 }
  0x60   : > { %s461_s25 = sshll.u32 %s894_s8, 2  ;;  %s204_s29 = scalar_lea.sflag [#allocation3], %s894_s8 }
  0x61   : > { %s898_s30 = scalar_lea.vmem [#allocation8], %s461_s25 }
  0x62   : > { %677 = dma.done.wait (%p1038_p13), %s204_s29, 64  }
  0x63   : > { %679 = vsyncadd (%p1038_p13), %s204_s29, 4294967232 }
  0x64   : > { %212 = sfence }
  0x65   : > { %v259_v0 = vlaneseq  ;;  %s905_s21 = smul.u32 12, %s698_s15  ;;  %s463_s22 = sld [smem:[#allocation7 + $0x1]]  ;;  %v464_v9 = vld [vmem:[%s898_s30 + $0x2] sm:$0x3]  ;;  %v275_v12 = vld [vmem:[%s898_s30] sm:$0x3] }
  0x66   : > { %s911_s9 = sld [smem:[#allocation7]]  ;;  %v279_v14 = vmul.f32 16.0, %v464_v9  ;;  %v278_v19 = vmul.f32 16.0, %v275_v12  ;;  %v713_v56 = vmov 1e-20   ;;  %p1039_p12 = scmp.ne.s32.totalorder %s1028_s23, 0 }
  0x67   : > { %v260_v1 = vshrl.u32 %v259_v0, 7  ;;  %v262_v2 = vand.u32 127, %v259_v0  ;;  %s233_s28 = sadd.s32 1, %s905_s21  ;;  %s909_s27 = sld [smem:[#allocation2 + %s905_s21]] }
  0x68   : > { %s913_s10 = sld [smem:[#allocation2 + %s233_s28]]  ;;  %s239_s11 = sadd.s32 4, %s905_s21 }
  0x69   : > { %v263_v3 = vmul.u32 128, %v260_v1  ;;  %s237_s20 = sadd.s32 3, %s905_s21  ;;  %s245_s4 = sadd.s32 7, %s905_s21 }
  0x6a   : > { %s243_s18 = sadd.s32 6, %s905_s21  ;;  %s253_s19 = sadd.s32 11, %s905_s21 }
  0x6b   : > { %v264_v4 = vadd.s32 %v263_v3, %v262_v2  ;;  %s235_s6 = sadd.s32 2, %s905_s21  ;;  %s921_s7 = sld [smem:[#allocation2 + %s239_s11]]  ;;  %v266_v6 = vstv %s463_s22 }
  0x6c   : > { %s923_s25 = sld [smem:[#allocation2 + %s237_s20]]  ;;  %s241_s1 = sadd.s32 5, %s905_s21  ;;  %v273_v11 = vstv %s911_s9 }
  0x6d   : > { %v265_v5 = vcvt.s32.f32 %v264_v4  ;;  %s925_s29 = sld [smem:[#allocation2 + %s245_s4]]  ;;  %s247_s2 = sadd.s32 8, %s905_s21  ;;  %v282_v21 = vstv %s909_s27 }
  0x6e   : > { %s927_s28 = sld [smem:[#allocation2 + %s243_s18]]  ;;  %s249_s22 = sadd.s32 9, %s905_s21  ;;  %v284_v15 = vstv %s913_s10 }
  0x6f   : > { %v267_v7 = vadd.f32 %v266_v6, %v265_v5  ;;  %s929_s0 = sld [smem:[#allocation2 + %s253_s19]]  ;;  %s251_s11 = sadd.s32 10, %s905_s21 }
  0x70   : > { %s933_s5 = sld [smem:[#allocation2 + %s235_s6]]  ;;  %s330_s9 = scalar_lea.sflag [#allocation4], %s894_s8 }
  0x71   : > { %v268_v8 = vadd.f32 0.5, %v267_v7  ;;  %s938_s20 = sld [smem:[#allocation2 + %s241_s1]]  ;;  %v291_v16 = vstv %s921_s7 }
  0x72   : > { %s940_s4 = sld [smem:[#allocation2 + %s247_s2]]  ;;  %v289_v22 = vstv %s923_s25 }
  0x73   : > { %v269_v10 = vmul.f32 0.0625, %v268_v8  ;;  %s944_s18 = sld [smem:[#allocation2 + %s249_s22]]  ;;  %v298_v20 = vstv %s925_s29 }
  0x74   : > { %s946_s19 = sld [smem:[#allocation2 + %s251_s11]]  ;;  %v296_v23 = vstv %s927_s28 }
  0x75   : > { %v270_v13 = vfloor.f32 %v269_v10  ;;  %v307_v24 = vstv %s929_s0  ;;  %s462_s0 = sshll.u32 %s894_s8, 1 }
  0x76   : > { %v287_v34 = vstv %s933_s5  ;;  %s230_s1 = scalar_lea.vmem [#allocation9], %s462_s0  ;;  %s466_s5 = sshll.u32 %s698_s15, 5 }
  0x77   : > { %v271_v17 = vmul.f32 16.0, %v270_v13  ;;  %v274_v18 = vadd.f32 %v273_v11, %v270_v13  ;;  %v294_v35 = vstv %s938_s20  ;;  %s344_s2 = sshll.u32 %s230_s1, 4  ;;  %s967_s27 = scalar_lea.hbm %s1017_s3, %s466_s5  ;;  %s962_s2 = int_to_ptr.vmem [resolvable:$true] %s344_s2 }
  0x78   : > { %v301_v36 = vstv %s940_s4  ;;  %s616_s10 = scalar_lea.vmem %s962_s2, 32  ;;  %s714_s15 = smov [#allocation9]  }
  0x79   : > { %v272_v25 = vsub.f32 %v267_v7, %v271_v17  ;;  %v281_v26 = vadd.f32 %v279_v14, %v274_v18  ;;  %v285_v27 = vmul.f32 %v284_v15, %v274_v18  ;;  %v292_v28 = vmul.f32 %v291_v16, %v274_v18  ;;  %p617_p4 = scmp.ne.s32.totalorder %s962_s2, %s616_s10  ;;  %s620_s6 = sshll.u32 %s714_s15, 4  ;;  %s621_s6 = int_to_ptr.vmem [resolvable:$false] %s620_s6 }
  0x7a   : > { %v299_v29 = vmul.f32 %v298_v20, %v274_v18  ;;  %v309_v42 = vstv %s944_s18  ;;  %v312_v43 = vstv %s946_s19  ;;  %s622_s7 = scalar_lea.vmem %s621_s6, 64  ;;  %p623_p10 = scmp.lt.s32.totalorder %s962_s2, %s621_s6 }
  0x7b   : > { %v280_v30 = vadd.f32 %v278_v19, %v272_v25  ;;  %v283_v31 = vmul.f32 %v282_v21, %v272_v25  ;;  %v290_v32 = vmul.f32 %v289_v22, %v272_v25  ;;  %v297_v33 = vmul.f32 %v296_v23, %v272_v25  ;;  %p618_p0 = pnand %p617_p4, %p1039_p12  ;;  %p624_p11 = scmp.lt.s32.totalorder %s622_s7, %s616_s10 }
  0x7c   : > { %v311_v37 = vmul.f32 %v307_v24, %v281_v26 }
  0x7d   : > { %v286_v38 = vadd.f32 %v285_v27, %v283_v31  ;;  %v293_v39 = vadd.f32 %v292_v28, %v290_v32  ;;  %v300_v40 = vadd.f32 %v299_v29, %v297_v33  ;;  %v308_v41 = vmul.f32 %v307_v24, %v280_v30  ;;  %p619_p5 = pneg %p618_p0  ;;  %p625_p3 = por %p624_p11, %p623_p10 }
  0x7e   : > { %v313_v50 = vsub.f32 %v311_v37, %v312_v43 }
  0x7f   : > { %v288_v44 = vadd.f32 %v287_v34, %v286_v38  ;;  %v295_v45 = vadd.f32 %v294_v35, %v293_v39  ;;  %v302_v46 = vadd.f32 %v301_v36, %v300_v40  ;;  %v310_v49 = vsub.f32 %v308_v41, %v309_v42  ;;  %p626_p7 = pnand %p625_p3, %p619_p5 }
  0x81   : > { %v303_v47 = vmul.f32 %v302_v46, %v280_v30  ;;  %v305_v48 = vmul.f32 %v302_v46, %v281_v26 }
  0x83   : > { %v304_v51 = vsub.f32 %v288_v44, %v303_v47  ;;  %v306_v52 = vsub.f32 %v295_v45, %v305_v48 }
  0x85   : > { %v314_v53 = vmul.f32 %v310_v49, %v304_v51  ;;  %v315_v54 = vmul.f32 %v313_v50, %v306_v52  ;;  %v317_v59 = vmul.f32 %v304_v51, %v304_v51  ;;  %v318_v60 = vmul.f32 %v306_v52, %v306_v52 }
  0x87   : > { %v316_v55 = vadd.f32 %v315_v54, %v314_v53  ;;  %v319_v63 = vadd.f32 %v318_v60, %v317_v59 }
  0x89   : > { %vm320_vm0 = vcmp.lt.f32.partialorder %v316_v55, 0.0 }
  0x8a   : > { %v321_v57 = vsel %vm320_vm0, -1e-20, %v713_v56 }
  0x8b   : > { %v322_v58 = vadd.f32 %v321_v57, %v316_v55 }
  0x8d   : > { %556 = vrcp.f32 %v322_v58 }
  0x97   : > { %v557_v61 = vpop.eup %556 }
  0x98   : > { %v324_v62 = vmul.f32 %v557_v61, %v322_v58 }
  0x9a   : > { %v325_v0 = vsub.f32 2.0, %v324_v62 }
  0x9c   : > { %v326_v1 = vmul.f32 %v557_v61, %v325_v0 }
  0x9e   : > { %v327_v2 = vmul.f32 %v326_v1, %v319_v63 }
  0xa0   : > { %328 = vst [vmem:[%s230_s1] sm:$0x3] %v327_v2 }
  0xa1   : > { %629 = shalt.err (!%p626_p7)
}
  0xa2   : > { %s630_s8 = scalar_lea.hbm %s967_s27, 32  ;;  %s634_s28 = scalar_lea.hbm %s1017_s3, 64 }
  0xa3   : > { %p631_p9 = scmp.ne.s32.totalorder %s967_s27, %s630_s8  ;;  %p635_p1 = scmp.lt.u32.totalorder %s967_s27, %s1017_s3 }
  0xa4   : > { %p636_p8 = scmp.lt.u32.totalorder %s634_s28, %s630_s8  ;;  %p638_p4 = scmp.lt.u32.totalorder %s630_s8, %s967_s27 }
  0xa5   : > { %p632_p2 = pnand %p631_p9, %p1039_p12 }
  0xa6   : > { %p637_p13 = por %p636_p8, %p635_p1 }
  0xa7   : > { %p633_p6 = pneg %p632_p2 }
  0xa8   : > { %p639_p0 = por %p638_p4, %p637_p13 }
  0xaa   : > { %p640_p5 = pnand %p639_p0, %p633_p6 }
  0xac   : > { %643 = shalt.err (!%p640_p5)
}
  0xad   : > { %480 = dma.vmem_to_hbm [thread:$0]  (%p1039_p12), %s962_s2, 32, %s967_s27, %s330_s9  }
  0xae PF: > { %s356_s20 = sand.u32 1, %s686_s12   ;;  %p1040_p10 = scmp.ne.s32.totalorder %s1029_s24, 0 }
  0xaf   : > { %p1041_p11 = scmp.ge.s32.totalorder %s706_s17, 2  ;;  %s357_s4 = scalar_lea.sflag [#allocation4], %s356_s20 }
  0xb1   : > { %p494_p3 = pnand %p1041_p11, %p1040_p10 }
  0xb3   : > { %681 = dma.done.wait (!%p494_p3), %s357_s4, 32  }
  0xb4   : > { %683 = vsyncadd (!%p494_p3), %s357_s4, 4294967264  ;;  %s21_s17 = sadd.s32 1, %s706_s17   ;;  %s1042_s23 = sld [smem:[#allocation14_spill]] }
  0xb5   : > { %p18_p7 = scmp.ge.s32.totalorder %s21_s17, 4   ;;  %s1043_s12 = smov %s690_s13 }
  0xb6   : > { %s1044_s13 = smov %s694_s14  ;;  %s1045_s14 = smov %s851_s26 }
  0xb7   : > { %s1046_s15 = smov %s702_s16  ;;  %20 = sbr.rel (!%p18_p7) target bundleno = 12 (0xc), region = 88 }
  0xba   : > { %s1047_s16 = smov %s1042_s23 }
  0xbe   :  { %362 = vsyncpa [#allocation3], 1 }
  0xbf   :  { %364 = vsyncpa [#allocation3 + $0x1], 1 }
  0xc0   :  { %365 = vsyncpa [#allocation4], 1 }
  0xc1   :  { %367 = vsyncpa [#allocation4 + $0x1], 1 }
  0xc2   :  { %368 = vsyncpa [#allocation5], 1 }
  0xc3   :  { %370 = vsyncpa [#allocation5 + $0x1], 1 }
  0xc4   :  { %371 = vsyncpa [#allocation6], 1 }
  0xc5   :  { %373 = vsyncpa [#allocation6 + $0x1], 1 }

</bundles_post_ra>
